<compile_context>
chip_gen: v7x
topology: tpu7x:2x2x1
jax: 0.10.0
libtpu: 0.0.40
codegen_flags: <defaults>
</compile_context>

<pallas_src>
import math
import functools

import jax
import jax.numpy as jnp
from jax import lax
from jax.experimental import pallas as pl
from jax.experimental.pallas import tpu as pltpu


# ----------------------------- Pallas kernels ------------------------------


def _mm_kernel(x_ref, w_ref, o_ref, acc_ref):
    """K-tiled matmul with f32 VMEM accumulator (init/finalize via pl.when)."""
    @pl.when(pl.program_id(0) == 0)
    def _():
        acc_ref[...] = jnp.zeros_like(acc_ref)

    acc_ref[...] += jnp.dot(x_ref[...], w_ref[...],
                            preferred_element_type=jnp.float32)

    @pl.when(pl.program_id(0) == pl.num_programs(0) - 1)
    def _():
        o_ref[...] = acc_ref[...]


def matmul_f32(x, w, *, tk=128):
    """out = x @ w, f32, tiled over K (M/N stay full at these toy shapes)."""
    M, K = x.shape
    N = w.shape[1]
    if K % tk != 0:
        tk = K
    return pl.pallas_call(
        _mm_kernel,
        out_shape=jax.ShapeDtypeStruct((M, N), jnp.float32),
        grid=(K // tk,),
        in_specs=[
            pl.BlockSpec((M, tk), lambda k: (0, k)),
            pl.BlockSpec((tk, N), lambda k: (k, 0)),
        ],
        out_specs=pl.BlockSpec((M, N), lambda k: (0, 0)),
        scratch_shapes=[pltpu.VMEM((M, N), jnp.float32)],
        compiler_params=pltpu.CompilerParams(dimension_semantics=("arbitrary",)),
    )(x, w)


def _embed_kernel(p_ref, w_ref, poscls_ref, o_ref, *, num_channels, p2):
    """Per-batch token embedding: z0[b] = [cls; pos] + sum_c patches_c @ W_c.

    p_ref block is (1, C, S, p2) where row s=0 of the patch values is all zero
    (CLS slot), so the output (S, D) is produced with a single dense store and
    the C<->L reorder of the PyTorch view() is expressed via per-channel weight
    slices — no transpose, no masked stores.
    """
    acc = poscls_ref[...]                                        # (S, D) f32
    for c in range(num_channels):
        pc = p_ref[0, c].astype(jnp.bfloat16)                    # (S, p2)
        wc = w_ref[c * p2:(c + 1) * p2, :]                       # (p2, D) bf16
        acc = acc + jnp.dot(pc, wc, preferred_element_type=jnp.float32)
    o_ref[0] = acc


def embed_tokens(patches, w_emb_t, pos_cls):
    B, C, S, p2 = patches.shape
    D = w_emb_t.shape[1]
    kernel = functools.partial(_embed_kernel, num_channels=C, p2=p2)
    return pl.pallas_call(
        kernel,
        out_shape=jax.ShapeDtypeStruct((B, S, D), jnp.float32),
        grid=(B,),
        in_specs=[
            pl.BlockSpec((1, C, S, p2), lambda b: (b, 0, 0, 0)),
            pl.BlockSpec((C * p2, D), lambda b: (0, 0)),
            pl.BlockSpec((S, D), lambda b: (0, 0)),
        ],
        out_specs=pl.BlockSpec((1, S, D), lambda b: (b, 0, 0)),
        compiler_params=pltpu.CompilerParams(dimension_semantics=("parallel",)),
    )(patches, w_emb_t, pos_cls)


def _encoder_layer_kernel(
    z_ref, wq_ref, wk_ref, wv_ref, bq_ref, bk_ref, bv_ref,
    wo_ref, bo_ref, ln1w_ref, ln1b_ref,
    w1_ref, b1_ref, w2_ref, b2_ref, ln2w_ref, ln2b_ref,
    o_ref, *, num_heads, ln_eps,
):
    """One post-LN TransformerEncoderLayer (ReLU FFN, eval mode) for one sequence.

    Attention is fully head-batched: per-head projection weights are laid out as
    (H, D, dh) / (H, dh, D) so every step is one batched dot_general — no
    per-head Python loop, no attention scratch buffer.
    """
    x = z_ref[0]                                   # (S, D) f32
    S, D = x.shape
    H = num_heads
    dh = D // H
    scale = 1.0 / math.sqrt(dh)

    # ---- multi-head self attention (torch.nn.MultiheadAttention semantics) ----
    xh = jnp.broadcast_to(x.astype(jnp.bfloat16)[None], (H, S, D))
    q = (jnp.einsum("hsd,hde->hse", xh, wq_ref[...],
                    preferred_element_type=jnp.float32) + bq_ref[...]) * scale
    k = jnp.einsum("hsd,hde->hse", xh, wk_ref[...],
                   preferred_element_type=jnp.float32) + bk_ref[...]
    v = jnp.einsum("hsd,hde->hse", xh, wv_ref[...],
                   preferred_element_type=jnp.float32) + bv_ref[...]

    s = jnp.einsum("hqe,hke->hqk", q, k,
                   preferred_element_type=jnp.float32)           # (H, S, S)
    s = s - jnp.max(s, axis=-1, keepdims=True)
    p = jnp.exp(s)
    p = p * pl.reciprocal(jnp.sum(p, axis=-1, keepdims=True), approx=True)
    ctx = jnp.einsum("hqk,hke->hqe", p, v,
                     preferred_element_type=jnp.float32)         # (H, S, dh)

    attn = jnp.sum(
        jnp.einsum("hse,hed->hsd", ctx.astype(jnp.bfloat16), wo_ref[...],
                   preferred_element_type=jnp.float32),
        axis=0) + bo_ref[...]                                    # (S, D)

    # ---- residual + LayerNorm 1 (post-norm) ----
    x = x + attn
    mu = jnp.mean(x, axis=-1, keepdims=True)
    var = jnp.mean((x - mu) ** 2, axis=-1, keepdims=True)
    x = (x - mu) * lax.rsqrt(var + ln_eps) * ln1w_ref[...] + ln1b_ref[...]

    # ---- feed-forward (ReLU), bf16 weights / f32 accumulation ----
    h1 = jnp.maximum(
        jnp.dot(x.astype(jnp.bfloat16), w1_ref[...],
                preferred_element_type=jnp.float32) + b1_ref[...], 0.0)
    ff = jnp.dot(h1.astype(jnp.bfloat16), w2_ref[...],
                 preferred_element_type=jnp.float32) + b2_ref[...]

    # ---- residual + LayerNorm 2 ----
    x = x + ff
    mu = jnp.mean(x, axis=-1, keepdims=True)
    var = jnp.mean((x - mu) ** 2, axis=-1, keepdims=True)
    o_ref[0] = (x - mu) * lax.rsqrt(var + ln_eps) * ln2w_ref[...] + ln2b_ref[...]


def encoder_layer(z, lp, *, num_heads, ln_eps=1e-5):
    B, S, D = z.shape
    kernel = functools.partial(_encoder_layer_kernel,
                               num_heads=num_heads, ln_eps=ln_eps)

    def const_spec(arr):
        return pl.BlockSpec(arr.shape, lambda b, _nd=arr.ndim: (0,) * _nd)

    weights = [lp["wq_h"], lp["wk_h"], lp["wv_h"],
               lp["bq_h"], lp["bk_h"], lp["bv_h"],
               lp["wo_h"], lp["bo"], lp["ln1_w"], lp["ln1_b"],
               lp["w1_t"], lp["b1"], lp["w2_t"], lp["b2"],
               lp["ln2_w"], lp["ln2_b"]]

    return pl.pallas_call(
        kernel,
        out_shape=jax.ShapeDtypeStruct((B, S, D), jnp.float32),
        grid=(B,),
        in_specs=[pl.BlockSpec((1, S, D), lambda b: (b, 0, 0))]
                 + [const_spec(w) for w in weights],
        out_specs=pl.BlockSpec((1, S, D), lambda b: (b, 0, 0)),
        compiler_params=pltpu.CompilerParams(dimension_semantics=("parallel",)),
    )(z, *weights)


def _cosface_kernel(y_ref, w_ref, label_ref, o_ref, *, s, m):
    y = y_ref[...]
    w = w_ref[...]
    yn = y * lax.rsqrt(jnp.maximum(jnp.sum(y * y, axis=-1, keepdims=True), 1e-24))
    wn = w * lax.rsqrt(jnp.maximum(jnp.sum(w * w, axis=-1, keepdims=True), 1e-24))
    cos = lax.dot_general(yn, wn, (((1,), (1,)), ((), ())),
                          preferred_element_type=jnp.float32)     # (B, N)
    ids = lax.broadcasted_iota(jnp.int32, cos.shape, 1)
    one_hot = (ids == label_ref[...]).astype(jnp.float32)
    o_ref[...] = s * (cos - m * one_hot)


def cosface(y, w, labels, *, s=30.0, m=0.40):
    # Toy num_ids fits full-block; at large num_ids tile N (stream weight rows).
    B, D = y.shape
    N = w.shape[0]
    kernel = functools.partial(_cosface_kernel, s=s, m=m)
    return pl.pallas_call(
        kernel,
        out_shape=jax.ShapeDtypeStruct((B, N), jnp.float32),
        grid=(1,),
        in_specs=[
            pl.BlockSpec((B, D), lambda i: (0, 0)),
            pl.BlockSpec((N, D), lambda i: (0, 0)),
            pl.BlockSpec((B, 1), lambda i: (0, 0)),
        ],
        out_specs=pl.BlockSpec((B, N), lambda i: (0, 0)),
    )(y, w, labels.reshape(B, 1).astype(jnp.int32))


# ------------------------- JAX glue (data-independent) ----------------------


def get_landmark_coords(image_size, num_landmarks):
    """Replicates PartfVit._get_patches: interleaved (x, y) landmark coords."""
    nps = int(math.sqrt(num_landmarks))
    temp = jnp.linspace(0.0, float(image_size), nps + 2)[1:-1]          # (nps,)
    temp = jnp.tile(temp[None, :], (nps, 1))                            # (nps, nps)
    y = temp.reshape(-1)
    x = temp.T.reshape(-1)
    coords = jnp.zeros((2 * num_landmarks,), jnp.float32)
    coords = coords.at[0::2].set(x).at[1::2].set(y)
    return coords


def build_sampling_matrix_t(lm_xy, H, W, ph, pw):
    """Transposed bilinear sampling matrix reproducing
    F.grid_sample(align_corners=False, padding_mode='zeros') for the patch grids
    of PartfVit._extract_landmarks.

    Returns (H*W, (L+1)*ph*pw) with the first ph*pw columns all-zero: this CLS
    slot lets downstream kernels emit full (S, D) token blocks densely.
    Kept in f32 to preserve the bilinear-weight semantics exactly.
    """
    L = lm_xy.shape[0]
    gx, gy = jnp.meshgrid(jnp.arange(-ph / 2.0, ph / 2.0),
                          jnp.arange(-pw / 2.0, pw / 2.0), indexing="ij")
    samp0 = -gy                      # grid_sample coord 0 (x / width) offset
    samp1 = gx                       # grid_sample coord 1 (y / height) offset
    g0 = (lm_xy[:, 0][:, None, None] + samp0[None]) / (0.5 * H) - 1.0
    g1 = (lm_xy[:, 1][:, None, None] + samp1[None]) / (0.5 * W) - 1.0
    ix = ((g0 + 1.0) * W - 1.0) * 0.5
    iy = ((g1 + 1.0) * H - 1.0) * 0.5
    x0 = jnp.floor(ix); x1 = x0 + 1.0
    y0 = jnp.floor(iy); y1 = y0 + 1.0
    wx1 = ix - x0; wx0 = 1.0 - wx1
    wy1 = iy - y0; wy0 = 1.0 - wy1

    rows = jnp.arange(L * ph * pw)
    M = jnp.zeros((L * ph * pw, H * W), jnp.float32)
    for yy, xx, ww in ((y0, x0, wy0 * wx0), (y0, x1, wy0 * wx1),
                       (y1, x0, wy1 * wx0), (y1, x1, wy1 * wx1)):
        yi = yy.astype(jnp.int32).reshape(-1)
        xi = xx.astype(jnp.int32).reshape(-1)
        wv = ww.reshape(-1)
        valid = (yi >= 0) & (yi < H) & (xi >= 0) & (xi < W)
        cols = jnp.clip(yi, 0, H - 1) * W + jnp.clip(xi, 0, W - 1)
        M = M.at[rows, cols].add(jnp.where(valid, wv, 0.0))
    M_ext = jnp.concatenate([jnp.zeros((ph * pw, H * W), jnp.float32), M], axis=0)
    return M_ext.T                                                   # (H*W, S*ph*pw)


def init_params(key, *, num_ids, num_landmarks, patch_size, mlp_dim, feat_dim,
                num_layers, num_heads):
    P = 3 * patch_size ** 2
    D = feat_dim
    H = num_heads
    dh = D // H
    ks = jax.random.split(key, 4 + num_layers)

    def xavier(k, fan_out, fan_in):
        b = math.sqrt(6.0 / (fan_in + fan_out))
        return jax.random.uniform(k, (fan_out, fan_in), jnp.float32, -b, b)

    pos_embedding = jax.random.normal(ks[1], (num_landmarks, D), jnp.float32)
    cls_token = jax.random.normal(ks[2], (D,), jnp.float32)

    params = {
        # bf16 weights, f32 accumulation inside kernels.
        "w_emb_t": xavier(ks[0], D, P).T.astype(jnp.bfloat16),          # (P, D)
        # Row 0 = cls token, rows 1.. = positional embedding (matches CLS-slot
        # zero block in the sampling matrix).
        "pos_cls": jnp.concatenate([cls_token[None, :], pos_embedding], axis=0),
        "cos_w": xavier(ks[3], num_ids, D),                             # (num_ids, D)
        "layers": [],
    }

    def per_head_in(wm):          # torch (D_out, D_in) -> (H, D_in, dh)
        return wm.T.reshape(D, H, dh).transpose(1, 0, 2).astype(jnp.bfloat16)

    for li in range(num_layers):
        lk = jax.random.split(ks[4 + li], 4)
        w_in = xavier(lk[0], 3 * D, D)                                  # in_proj (3D, D)
        wq, wk, wv = w_in[0:D], w_in[D:2 * D], w_in[2 * D:3 * D]
        wo = xavier(lk[1], D, D)                                        # out_proj (D, D)
        zero_b = jnp.zeros((H, 1, dh), jnp.float32)                     # in_proj bias = 0
        params["layers"].append({
            "wq_h": per_head_in(wq), "wk_h": per_head_in(wk), "wv_h": per_head_in(wv),
            "bq_h": zero_b, "bk_h": zero_b, "bv_h": zero_b,
            "wo_h": wo.T.reshape(D, D)[..., :].reshape(H, dh, D).astype(jnp.bfloat16),
            "bo": jnp.full((1, D), 0.5, jnp.float32),
            "ln1_w": jnp.ones((1, D), jnp.float32),
            "ln1_b": jnp.full((1, D), 0.5, jnp.float32),
            "w1_t": xavier(lk[2], mlp_dim, D).T.astype(jnp.bfloat16),   # (D, mlp)
            "b1": jnp.full((1, mlp_dim), 0.5, jnp.float32),
            "w2_t": xavier(lk[3], D, mlp_dim).T.astype(jnp.bfloat16),   # (mlp, D)
            "b2": jnp.full((1, D), 0.5, jnp.float32),
            "ln2_w": jnp.ones((1, D), jnp.float32),
            "ln2_b": jnp.full((1, D), 0.5, jnp.float32),
        })
    return params


def partfvit_forward(params, batch, pred, *, image_size, num_landmarks,
                     patch_size, num_heads, eps):
    B, C, H, W = batch.shape
    L = num_landmarks
    ph = pw = patch_size
    S = L + 1

    # landmark grid + min/max normalization (identical per batch row)
    lm = get_landmark_coords(image_size, L)
    tmin, tmax = jnp.min(lm), jnp.max(lm)
    lm = (lm - tmin) / (tmax - tmin + eps) * (image_size - 1)
    lm_xy = lm.reshape(L, 2)

    # grid_sample patch extraction as a K-tiled Pallas matmul (CLS slot = zeros)
    Mt = build_sampling_matrix_t(lm_xy, H, W, ph, pw)            # (H*W, S*p^2)
    x_rows = batch.reshape(B * C, H * W).astype(jnp.float32)
    patches = matmul_f32(x_rows, Mt)                             # (B*C, S*p^2)
    patches = patches.reshape(B, C, S, ph * pw)                  # contiguous split: free

    # linear embedding + positional embedding + CLS token — one dense kernel
    z = embed_tokens(patches, params["w_emb_t"], params["pos_cls"])   # (B, S, D)

    # transformer encoder (post-LN, ReLU, eval mode: dropout = identity)
    for lp in params["layers"]:
        z = encoder_layer(z, lp, num_heads=num_heads)

    y_score = z[:, 0, :]                                         # (B, D)
    # TODO(synk): MarginCosineProduct source not provided; standard CosFace (s=30, m=0.4).
    logits = cosface(y_score, params["cos_w"], pred)
    return logits


# ----------------------------------- main -----------------------------------

if __name__ == "__main__":
    B = 2
    image_size = 16
    num_landmarks = 4          # 2x2 landmark grid
    patch_size = 4
    feat_dim = 32
    mlp_dim = 64
    num_heads = 4
    num_layers = 2
    num_ids = 8
    eps = 1e-6

    key = jax.random.PRNGKey(0)
    k_img, k_lbl, k_par = jax.random.split(key, 3)
    batch = jax.random.normal(k_img, (B, 3, image_size, image_size), jnp.float32)
    pred = jax.random.randint(k_lbl, (B,), 0, num_ids, jnp.int32)
    params = init_params(k_par, num_ids=num_ids, num_landmarks=num_landmarks,
                         patch_size=patch_size, mlp_dim=mlp_dim,
                         feat_dim=feat_dim, num_layers=num_layers,
                         num_heads=num_heads)

    logits = partfvit_forward(params, batch, pred,
                              image_size=image_size, num_landmarks=num_landmarks,
                              patch_size=patch_size, num_heads=num_heads, eps=eps)
    jax.block_until_ready(logits)
    assert logits.shape == (B, num_ids)
    assert bool(jnp.all(jnp.isfinite(logits)))
    print("KERNEL_OK")
</pallas_src>

<mosaic_0001>
module attributes {stable_mosaic.version = 11 : i64} {
  func.func @_mm_kernel(%arg0: i32, %arg1: memref<6x128xf32, #tpu.memory_space<vmem>>, %arg2: memref<128x80xf32, #tpu.memory_space<vmem>>, %arg3: memref<6x80xf32, #tpu.memory_space<vmem>>, %arg4: memref<6x80xf32, #tpu.memory_space<vmem>>) attributes {dimension_semantics = [#tpu.dimension_semantics<arbitrary>], iteration_bounds = array<i64: 2>, scalar_prefetch = 0 : i64, scratch_operands = 1 : i64, tpu.core_type = #tpu.core_type<tc>, window_params = [{transform_indices = @transform_0, window_bounds = array<i64: 6, 128>}, {transform_indices = @transform_1, window_bounds = array<i64: 128, 80>}, {pipeline_mode = #tpu.pipeline_mode<synchronous>, transform_indices = @transform_2, window_bounds = array<i64: 6, 80>}]} {
    %c0_i32 = arith.constant 0 : i32
    %0 = arith.cmpi eq, %arg0, %c0_i32 : i32
    %1 = arith.extui %0 : i1 to i32
    %c0_i32_0 = arith.constant 0 : i32
    %2 = arith.cmpi ne, %1, %c0_i32_0 : i32
    scf.if %2 {
      %cst_9 = arith.constant 0.000000e+00 : f32
      %12 = vector.broadcast %cst_9 : f32 to vector<6x80xf32>
      %c0_10 = arith.constant 0 : index
      %c0_11 = arith.constant 0 : index
      %13 = vector.load %arg4[%c0_10, %c0_11] : memref<6x80xf32, #tpu.memory_space<vmem>>, vector<6x80xf32>
      tpu.vector_store %arg4[%c0_10, %c0_11], %12 {strides = array<i32>} : memref<6x80xf32, #tpu.memory_space<vmem>>, vector<6x80xf32>,
    } else {
    }
    %c0 = arith.constant 0 : index
    %c0_1 = arith.constant 0 : index
    %3 = vector.load %arg4[%c0, %c0_1] : memref<6x80xf32, #tpu.memory_space<vmem>>, vector<6x80xf32>
    %c0_2 = arith.constant 0 : index
    %c0_3 = arith.constant 0 : index
    %4 = vector.load %arg1[%c0_2, %c0_3] : memref<6x128xf32, #tpu.memory_space<vmem>>, vector<6x128xf32>
    %c0_4 = arith.constant 0 : index
    %c0_5 = arith.constant 0 : index
    %5 = vector.load %arg2[%c0_4, %c0_5] : memref<128x80xf32, #tpu.memory_space<vmem>>, vector<128x80xf32>
    %cst = arith.constant dense<0.000000e+00> : vector<6x80xf32>
    %6 = tpu.matmul %4, %5, %cst {dimension_numbers = #tpu.dot_dimension_numbers<[1], [0], [0], [1], [0, 0, 1, 1], [], []>} : vector<6x128xf32>, vector<128x80xf32>, vector<6x80xf32> -> vector<6x80xf32>
    %7 = arith.addf %3, %6 : vector<6x80xf32>
    %c0_6 = arith.constant 0 : index
    %c0_7 = arith.constant 0 : index
    %8 = vector.load %arg4[%c0_6, %c0_7] : memref<6x80xf32, #tpu.memory_space<vmem>>, vector<6x80xf32>
    tpu.vector_store %arg4[%c0_6, %c0_7], %7 {strides = array<i32>} : memref<6x80xf32, #tpu.memory_space<vmem>>, vector<6x80xf32>,
    %c1_i32 = arith.constant 1 : i32
    %9 = arith.cmpi eq, %arg0, %c1_i32 : i32
    %10 = arith.extui %9 : i1 to i32
    %c0_i32_8 = arith.constant 0 : i32
    %11 = arith.cmpi ne, %10, %c0_i32_8 : i32
    scf.if %11 {
      %c0_9 = arith.constant 0 : index
      %c0_10 = arith.constant 0 : index
      %12 = vector.load %arg4[%c0_9, %c0_10] : memref<6x80xf32, #tpu.memory_space<vmem>>, vector<6x80xf32>
      %c0_11 = arith.constant 0 : index
      %c0_12 = arith.constant 0 : index
      %13 = vector.load %arg3[%c0_11, %c0_12] : memref<6x80xf32, #tpu.memory_space<vmem>>, vector<6x80xf32>
      tpu.vector_store %arg3[%c0_11, %c0_12], %12 {strides = array<i32>} : memref<6x80xf32, #tpu.memory_space<vmem>>, vector<6x80xf32>,
    } else {
    }
    return
  }
  func.func @transform_0(%arg0: i32) -> (i32, i32) {
    %c0_i32 = arith.constant 0 : i32
    %c0_i32_0 = arith.constant 0 : i32
    return %c0_i32, %arg0 : i32, i32
  }
  func.func @transform_1(%arg0: i32) -> (i32, i32) {
    %c0_i32 = arith.constant 0 : i32
    %c0_i32_0 = arith.constant 0 : i32
    return %arg0, %c0_i32 : i32, i32
  }
  func.func @transform_2(%arg0: i32) -> (i32, i32) {
    %c0_i32 = arith.constant 0 : i32
    %c0_i32_0 = arith.constant 0 : i32
    %c0_i32_1 = arith.constant 0 : i32
    return %c0_i32, %c0_i32_0 : i32, i32
  }
}

</mosaic_0001>

<bundles_post_ra>
// kernel: tpu_custom_call.1
= control target key start
LH: loop header
LB: loop body
LE: loop exit
PB: predicated region body
PF: predicated region fallthrough
CT: control target
= control target key end

     0   :  { %7 = vsyncpa [#allocation4], 0  ;;  %s476_s9 = smov 0   ;;  %s544_s0 = inlined_call_operand.vmem [shape: f32[6,256], index: 0, kind: input, shape index: {}]   ;;  %s545_s1 = inlined_call_operand.vmem [shape: f32[256,80], index: 1, kind: input, shape index: {}]   ;;  %s546_s2 = inlined_call_operand.hbm [shape: f32[6,80], index: 2, kind: output, shape index: {}]  }
   0x1 LB: > { %s482_s10 = sadd.s32 4294967295, %s454_s9   ;;  %p313_p0 = scmp.ge.s32.totalorder %s454_s9, 1  ;;  %s454_s9 = sphi %s476_s9, %s13_s9  }
   0x2   : > { %p118_p1 = scmp.lt.s32.totalorder %s454_s9, 3 }
   0x4   : > { %p119_p2 = pnand %p313_p0, %p118_p1 }
   0x5   : > { %p139_p3 = scmp.lt.s32.totalorder (!%p119_p2), %s482_s10, 1  ;;  %s315_s11 = sshll.u32 (!%p119_p2), %s482_s10, 4 }
   0x6   : > { %122 = sbr.rel (%p119_p2) target bundleno = 303 (0x12f), region = 28  ;;  %p144_p4 = scmp.lt.s32.totalorder (!%p119_p2), %s315_s11, 31 }
   0x7   : > { %p317_p5 = scmp.ne.s32.totalorder (!%p119_p2), %s482_s10, 0 }
   0xd   : > { %s140_s12 = scalar_select %p139_p3, %s482_s10, 1 }
   0xe   : > { %s548_s11 = smov (!%p144_p4, %s315_s11), 31  ;;  %152 = sbr.rel (%p317_p5) target bundleno = 21 (0x15), region = 32 }
   0xf   : > { %s314_s13 = sshll.u32 %s140_s12, 3  ;;  %s316_s17 = sshll.u32 %s548_s11, 3  ;;  %vm153_vm0 = vcmask (!%p317_p5), 652288   ;;  %v456_v0 = vmov (!%p317_p5), 0.0  }
  0x10   : > { %s492_s16 = scalar_lea.vmem %s544_s0, %s314_s13  ;;  %s497_s20 = scalar_lea.vmem %s545_s1, %s316_s17  ;;  %154 = vst.msk [vmem:[#allocation2] sm:$0x3f] (!%p317_p5), %vm153_vm0, %v456_v0 }
  0x15 PF: > { %v157_v1 = vld [vmem:[%s497_s20] sm:$0xff]  ;;  %v158_v2 = vld [vmem:[%s497_s20 + $0x8] sm:$0xff]  ;;  %v159_v3 = vld [vmem:[%s497_s20 + $0x10] sm:$0xff]  ;;  %v457_v4 = vmov 0.0|0.0   ;;  %vm458_vm1 = vmmov 0   ;;  %v459_v7 = vmov 0.0  }
  0x16   : > { %375 = vmatprep.subr.bf16.mxu0 %v457_v4  ;;  %v376_v5 = vpack.c.bf16 %v158_v2, %v157_v1  ;;  %v160_v6 = vld [vmem:[%s497_s20 + $0x18] sm:$0xff]  ;;  %372 = vmatprep.mubr.msk.f32.mxu0 %vm458_vm1, %v459_v7  ;;  %v161_v9 = vld [vmem:[%s497_s20 + $0x20] sm:$0xff]  ;;  %v162_v10 = vld [vmem:[%s497_s20 + $0x28] sm:$0xff]  ;;  %vm244_vm2 = vcmask 652288   ;;  %p318_p6 = scmp.ne.s32.totalorder %s482_s10, 1 }
  0x17   : > { %v379_v8 = vpack.c.bf16 %v160_v6, %v159_v3  ;;  %v382_v11 = vpack.c.bf16 %v162_v10, %v161_v9  ;;  %v163_v12 = vld [vmem:[%s497_s20 + $0x30] sm:$0xff]  ;;  %v164_v13 = vld [vmem:[%s497_s20 + $0x38] sm:$0xff]  ;;  %v165_v15 = vld [vmem:[%s497_s20 + $0x40] sm:$0xff] }
  0x18   : > { %377 = vmatpush3.bf16.msra.mxu0 %v376_v5  ;;  %v385_v14 = vpack.c.bf16 %v164_v13, %v163_v12  ;;  %v166_v16 = vld [vmem:[%s497_s20 + $0x48] sm:$0xff]  ;;  %v167_v18 = vld [vmem:[%s497_s20 + $0x50] sm:$0xff]  ;;  %v168_v19 = vld [vmem:[%s497_s20 + $0x58] sm:$0xff] }
  0x19   : > { %378 = vmatprep.subr.bf16.mxu0 %v457_v4  ;;  %v388_v17 = vpack.c.bf16 %v166_v16, %v165_v15  ;;  %v391_v20 = vpack.c.bf16 %v168_v19, %v167_v18  ;;  %v169_v21 = vld [vmem:[%s497_s20 + $0x60] sm:$0xff]  ;;  %v170_v22 = vld [vmem:[%s497_s20 + $0x68] sm:$0xff]  ;;  %v171_v24 = vld [vmem:[%s497_s20 + $0x70] sm:$0xff] }
  0x1a   : > { %v394_v23 = vpack.c.bf16 %v170_v22, %v169_v21  ;;  %v172_v25 = vld [vmem:[%s497_s20 + $0x78] sm:$0xff]  ;;  %v156_v27 = vld [vmem:[%s492_s16] sm:$0x3f] }
  0x1b   : > { %v397_v26 = vpack.c.bf16 %v172_v25, %v171_v24  ;;  %v155_v28 = vld [vmem:[#allocation2] sm:$0x3f] }
  0x1c   : > { %380 = vmatpush3.bf16.msra.mxu0 %v379_v8 }
  0x1d   : > { %381 = vmatprep.subr.bf16.mxu0 %v457_v4 }
  0x20   : > { %383 = vmatpush3.bf16.msra.mxu0 %v382_v11 }
  0x21   : > { %384 = vmatprep.subr.bf16.mxu0 %v457_v4 }
  0x24   : > { %386 = vmatpush3.bf16.msra.mxu0 %v385_v14 }
  0x25   : > { %387 = vmatprep.subr.bf16.mxu0 %v457_v4 }
  0x28   : > { %389 = vmatpush3.bf16.msra.mxu0 %v388_v17 }
  0x29   : > { %390 = vmatprep.subr.bf16.mxu0 %v457_v4 }
  0x2c   : > { %392 = vmatpush3.bf16.msra.mxu0 %v391_v20 }
  0x2d   : > { %393 = vmatprep.subr.bf16.mxu0 %v457_v4 }
  0x30   : > { %395 = vmatpush3.bf16.msra.mxu0 %v394_v23 }
  0x31   : > { %396 = vmatprep.subr.bf16.mxu0 %v457_v4 }
  0x34   : > { %398 = vmatpush3.bf16.msra.mxu0 %v397_v26 }
  0x37   : > { %373 = vmatmul.mubr.f32.vlgmr.msra.gmra.mrb[0].mxu0 %v156_v27 }
 0x107   : > { %249 = sbr.rel (%p318_p6) target bundleno = 278 (0x116), region = 36 }
 0x10a   : > { %v239_v29 = vpop.f32.mrb[0].mxu0 }
 0x10b   : > { %v243_v30 = vadd.f32 %v239_v29, %v155_v28  ;;  %v374_v31 = vpop.f32.mrb[1].mxu0 }
 0x10d   : > { %245 = vst.msk [vmem:[#allocation2] sm:$0x3f] %vm244_vm2, %v243_v30 }
 0x114   : > { %v250_v32 = vld [vmem:[#allocation2] sm:$0x3f] }
 0x115   : > { %251 = vst.msk [vmem:[#allocation3] sm:$0x3f] %vm244_vm2, %v250_v32 }
 0x116 PF: > { %p403_p7 = scmp.eq.s32.totalorder %s482_s10, 1  ;;  %s460_s21 = smov [#allocation3]  }
 0x117   : > { %s259_s22 = sshll.u32 %s460_s21, 4  ;;  %s260_s22 = int_to_ptr.vmem [resolvable:$true] %s259_s22 }
 0x118   : > { %s418_s23 = scalar_lea.vmem %s260_s22, 128  ;;  %p425_p11 = scmp.lt.s32.totalorder %s260_s22, %s260_s22 }
 0x119   : > { %p419_p8 = scmp.ne.s32.totalorder %s260_s22, %s418_s23  ;;  %p426_p12 = scmp.lt.s32.totalorder %s418_s23, %s418_s23 }
 0x11b   : > { %p420_p9 = pnand %p419_p8, %p403_p7  ;;  %p427_p13 = por %p426_p12, %p425_p11 }
 0x11d   : > { %p421_p10 = pneg %p420_p9 }
 0x11f   : > { %p428_p0 = pnand %p427_p13, %p421_p10 }
 0x121   : > { %431 = shalt.err (!%p428_p0)
}
 0x122   : > { %s432_s26 = scalar_lea.hbm %s546_s2, 128 }
 0x123   : > { %p433_p1 = scmp.ne.s32.totalorder %s546_s2, %s432_s26  ;;  %p438_p4 = scmp.lt.u32.totalorder %s432_s26, %s546_s2 }
 0x125   : > { %p434_p2 = pnand %p433_p1, %p403_p7 }
 0x127   : > { %p435_p3 = pneg %p434_p2 }
 0x129   : > { %p440_p5 = pnand %p438_p4, %p435_p3 }
 0x12b   : > { %443 = shalt.err (!%p440_p5)
}
 0x12c   : > { %400 = dma.vmem_to_hbm [thread:$0]  (%p403_p7), %s260_s22, 128, %s546_s2, [#allocation4]  }
 0x12d   : > { %449 = dma.done.wait (%p403_p7), [#allocation4], 128  }
 0x12e   : > { %451 = vsyncadd (%p403_p7), [#allocation4], 4294967168 }
 0x12f PF: > { %s13_s9 = sadd.s32 1, %s454_s9  }
 0x130   : > { %p10_p6 = scmp.ge.s32.totalorder %s13_s9, 4  }
 0x132   :  { %12 = sbr.rel (!%p10_p6) target bundleno = 1 (0x1), region = 66 }
 0x139   :  { %272 = vsyncpa [#allocation4], 1 }
 0x13a   :  { %274 = vsyncpa [#allocation4 + $0x1], 1 }

</bundles_post_ra>
